<compile_context>
chip_gen: v5e
topology: v5e:2x2
jax: 0.10.0
libtpu: 0.0.40
codegen_flags: <defaults>
</compile_context>

<pallas_src>
import jax
import jax.numpy as jnp
from jax.experimental import pallas as pl
from jax.experimental.pallas import tpu as pltpu

EPS = 1e-5
_LANE = 128
_TILE_BUDGET_BYTES = 4 * 1024 * 1024   # per (N, TS) tile, keeps ~4 resident copies small


def _round_up(x, m):
    return ((x + m - 1) // m) * m


def _choose_feature_tile(n_rows, s_pad, itemsize):
    """Largest lane-dense tile that divides s_pad and fits the VMEM budget."""
    for cand in (2048, 1024, 512, 256, 128):
        if s_pad % cand == 0 and n_rows * cand * itemsize <= _TILE_BUDGET_BYTES:
            return min(cand, s_pad)
    # s_pad is always a multiple of 128, so this is a valid fallback.
    # TODO(synk): for very large N (tile > budget even at TS=128), switch to a
    # streaming sum/sumsq reduction over an N-tiled "arbitrary" grid axis.
    return min(_LANE, s_pad)


def _bn_lastdim_kernel(x_ref, gamma_ref, beta_ref, o_ref):
    # x_ref: (N, TS), gamma_ref/beta_ref: (1, TS), o_ref: (N, TS)
    x = x_ref[...].astype(jnp.float32)
    n = x.shape[0]
    inv_n = 1.0 / n

    # Single pass over the tile: sum and sum-of-squares.
    mean = jnp.sum(x, axis=0, keepdims=True) * inv_n            # (1, TS)
    ex2 = jnp.sum(x * x, axis=0, keepdims=True) * inv_n         # (1, TS)
    var = jnp.maximum(ex2 - mean * mean, 0.0)                   # biased variance

    inv_std = jax.lax.rsqrt(var + EPS)                          # (1, TS)
    scale = gamma_ref[...] * inv_std                            # (1, TS)
    shift = beta_ref[...] - mean * scale                        # (1, TS)

    # Fused normalize + affine, no extra full-tile temporaries.
    o_ref[...] = (x * scale + shift).astype(o_ref.dtype)


def batch_norm_last_dim(x, gamma, beta):
    """Applies BatchNorm1d (training-mode batch stats) over the last dim of x."""
    s = x.shape[-1]
    if gamma.shape[-1] != s or beta.shape[-1] != s:
        raise ValueError("gamma/beta must have shape (s,)")
    init_shape = x.shape
    x_flat = x.reshape((-1, s))                                 # (N, S)
    n = x_flat.shape[0]
    itemsize = jnp.dtype(x.dtype).itemsize

    # Pad the feature axis to a lane-dense multiple of 128.
    s_pad = _round_up(s, _LANE)
    ts = _choose_feature_tile(n, s_pad, itemsize)
    s_pad = _round_up(s_pad, ts)                                # divisible by ts

    if s_pad != s:
        x_flat = jnp.pad(x_flat, ((0, 0), (0, s_pad - s)))
        gamma = jnp.pad(gamma, ((0, s_pad - s),), constant_values=1.0)
        beta = jnp.pad(beta, ((0, s_pad - s),))

    gamma2d = gamma.reshape((1, s_pad)).astype(jnp.float32)
    beta2d = beta.reshape((1, s_pad)).astype(jnp.float32)

    grid = (s_pad // ts,)

    # Explicit VMEM limit: ~4 resident (N, TS) copies (double-buffered in+out)
    # plus gamma/beta, clamped to stay safe on v5e (16 MiB default) and v7x
    # (64 MiB physical).
    vmem_bytes = 4 * n * ts * itemsize + 8 * ts * 4 + (2 << 20)
    vmem_bytes = int(min(max(vmem_bytes, 8 << 20), 48 << 20))

    cost = pl.CostEstimate(
        flops=5 * n * s_pad,
        transcendentals=s_pad,
        bytes_accessed=2 * n * s_pad * itemsize,
    )

    out_flat = pl.pallas_call(
        _bn_lastdim_kernel,
        out_shape=jax.ShapeDtypeStruct((n, s_pad), x.dtype),
        grid=grid,
        in_specs=[
            pl.BlockSpec((n, ts), lambda j: (0, j)),
            pl.BlockSpec((1, ts), lambda j: (0, j)),
            pl.BlockSpec((1, ts), lambda j: (0, j)),
        ],
        out_specs=pl.BlockSpec((n, ts), lambda j: (0, j)),
        compiler_params=pltpu.CompilerParams(
            dimension_semantics=("parallel",),
            vmem_limit_bytes=vmem_bytes,
        ),
        cost_estimate=cost,
    )(x_flat, gamma2d, beta2d)

    if s_pad != s:
        out_flat = out_flat[:, :s]
    return out_flat.reshape(init_shape)


class BatchNormLastDimPallas:
    """Mirror of the PyTorch module; parameters initialized like nn.BatchNorm1d."""

    def __init__(self, s):
        self.s = s
        # nn.BatchNorm1d init: weight=1, bias=0 (deterministic).
        self.gamma = jnp.ones((s,), dtype=jnp.float32)
        self.beta = jnp.zeros((s,), dtype=jnp.float32)
        # TODO(synk): running_mean/running_var buffers are not tracked; only
        # the training-mode forward output is reproduced.

    def __call__(self, x):
        if x.shape[-1] != self.s:
            raise ValueError(
                "batch norm last dim does not have right shape. "
                "should be {}, but is {}".format(self.s, x.shape[-1])
            )
        return batch_norm_last_dim(x, self.gamma, self.beta)


def _reference(x, gamma, beta):
    s = x.shape[-1]
    xf = x.reshape((-1, s)).astype(jnp.float32)
    mean = jnp.mean(xf, axis=0, keepdims=True)
    var = jnp.mean((xf - mean) ** 2, axis=0, keepdims=True)
    y = (xf - mean) / jnp.sqrt(var + EPS) * gamma + beta
    return y.reshape(x.shape).astype(x.dtype)


if __name__ == "__main__":
    key = jax.random.PRNGKey(0)
    batch, seq, hidden = 2, 8, 32
    x = jax.random.normal(key, (batch, seq, hidden), dtype=jnp.float32)

    module = BatchNormLastDimPallas(hidden)
    out = module(x)
    out = jax.block_until_ready(out)

    ref = _reference(x, module.gamma, module.beta)
    assert out.shape == x.shape
    assert jnp.allclose(out, ref, atol=1e-4, rtol=1e-4)

    print("KERNEL_OK")
</pallas_src>

<mosaic_0001>
module attributes {stable_mosaic.version = 11 : i64} {
  func.func @_bn_lastdim_kernel(%arg0: i32, %arg1: memref<16x128xf32, #tpu.memory_space<vmem>>, %arg2: memref<1x128xf32, #tpu.memory_space<vmem>>, %arg3: memref<1x128xf32, #tpu.memory_space<vmem>>, %arg4: memref<16x128xf32, #tpu.memory_space<vmem>>) attributes {dimension_semantics = [#tpu.dimension_semantics<parallel>], iteration_bounds = array<i64: 1>, scalar_prefetch = 0 : i64, scratch_operands = 0 : i64, tpu.core_type = #tpu.core_type<tc>, window_params = [{transform_indices = @transform_0, window_bounds = array<i64: 16, 128>}, {transform_indices = @transform_1, window_bounds = array<i64: 1, 128>}, {transform_indices = @transform_2, window_bounds = array<i64: 1, 128>}, {transform_indices = @transform_3, window_bounds = array<i64: 16, 128>}]} {
    %c0 = arith.constant 0 : index
    %c0_0 = arith.constant 0 : index
    %0 = vector.load %arg1[%c0, %c0_0] : memref<16x128xf32, #tpu.memory_space<vmem>>, vector<16x128xf32>
    %cst = arith.constant dense<0.000000e+00> : vector<128xf32>
    %1 = vector.multi_reduction <add>, %0, %cst [0] : vector<16x128xf32> to vector<128xf32>
    %2 = vector.shape_cast %1 : vector<128xf32> to vector<1x128xf32>
    %cst_1 = arith.constant 6.250000e-02 : f32
    %3 = vector.broadcast %cst_1 : f32 to vector<1x128xf32>
    %4 = arith.mulf %2, %3 : vector<1x128xf32>
    %5 = arith.mulf %0, %0 : vector<16x128xf32>
    %cst_2 = arith.constant dense<0.000000e+00> : vector<128xf32>
    %6 = vector.multi_reduction <add>, %5, %cst_2 [0] : vector<16x128xf32> to vector<128xf32>
    %7 = vector.shape_cast %6 : vector<128xf32> to vector<1x128xf32>
    %cst_3 = arith.constant 6.250000e-02 : f32
    %8 = vector.broadcast %cst_3 : f32 to vector<1x128xf32>
    %9 = arith.mulf %7, %8 : vector<1x128xf32>
    %10 = arith.mulf %4, %4 : vector<1x128xf32>
    %11 = arith.subf %9, %10 : vector<1x128xf32>
    %cst_4 = arith.constant 0.000000e+00 : f32
    %12 = vector.broadcast %cst_4 : f32 to vector<1x128xf32>
    %13 = arith.maximumf %11, %12 : vector<1x128xf32>
    %cst_5 = arith.constant 9.99999974E-6 : f32
    %14 = vector.broadcast %cst_5 : f32 to vector<1x128xf32>
    %15 = arith.addf %13, %14 : vector<1x128xf32>
    %16 = math.rsqrt %15 : vector<1x128xf32>
    %c0_6 = arith.constant 0 : index
    %c0_7 = arith.constant 0 : index
    %17 = vector.load %arg2[%c0_6, %c0_7] : memref<1x128xf32, #tpu.memory_space<vmem>>, vector<1x128xf32>
    %18 = arith.mulf %17, %16 : vector<1x128xf32>
    %c0_8 = arith.constant 0 : index
    %c0_9 = arith.constant 0 : index
    %19 = vector.load %arg3[%c0_8, %c0_9] : memref<1x128xf32, #tpu.memory_space<vmem>>, vector<1x128xf32>
    %20 = arith.mulf %4, %18 : vector<1x128xf32>
    %21 = arith.subf %19, %20 : vector<1x128xf32>
    %22 = vector.broadcast %18 : vector<1x128xf32> to vector<16x128xf32>
    %23 = arith.mulf %0, %22 : vector<16x128xf32>
    %24 = vector.broadcast %21 : vector<1x128xf32> to vector<16x128xf32>
    %25 = arith.addf %23, %24 : vector<16x128xf32>
    %c0_10 = arith.constant 0 : index
    %c0_11 = arith.constant 0 : index
    %26 = vector.load %arg4[%c0_10, %c0_11] : memref<16x128xf32, #tpu.memory_space<vmem>>, vector<16x128xf32>
    tpu.vector_store %arg4[%c0_10, %c0_11], %25 {strides = array<i32>} : memref<16x128xf32, #tpu.memory_space<vmem>>, vector<16x128xf32>,
    return
  }
  func.func @transform_0(%arg0: i32) -> (i32, i32) {
    %c0_i32 = arith.constant 0 : i32
    %c0_i32_0 = arith.constant 0 : i32
    return %c0_i32, %arg0 : i32, i32
  }
  func.func @transform_1(%arg0: i32) -> (i32, i32) {
    %c0_i32 = arith.constant 0 : i32
    %c0_i32_0 = arith.constant 0 : i32
    return %c0_i32, %arg0 : i32, i32
  }
  func.func @transform_2(%arg0: i32) -> (i32, i32) {
    %c0_i32 = arith.constant 0 : i32
    %c0_i32_0 = arith.constant 0 : i32
    return %c0_i32, %arg0 : i32, i32
  }
  func.func @transform_3(%arg0: i32) -> (i32, i32) {
    %c0_i32 = arith.constant 0 : i32
    %c0_i32_0 = arith.constant 0 : i32
    return %c0_i32, %arg0 : i32, i32
  }
}

</mosaic_0001>

<bundles_post_ra>
// kernel: tpu_custom_call.1
= control target key start
LH: loop header
LB: loop body
LE: loop exit
PB: predicated region body
PF: predicated region fallthrough
CT: control target
= control target key end

     0   :  { %8 = vsyncpa [#allocation3], 0  ;;  %s244_s0 = inlined_call_operand.hbm [shape: f32[16,128], index: 0, kind: input, shape index: {}]   ;;  %s245_s1 = inlined_call_operand.hbm [shape: f32[1,128], index: 1, kind: input, shape index: {}]   ;;  %s246_s2 = inlined_call_operand.vmem [shape: f32[1,128], index: 2, kind: input, shape index: {}]   ;;  %s247_s3 = inlined_call_operand.hbm [shape: f32[16,128], index: 3, kind: output, shape index: {}]  }
   0x1   :  { %9 = vsyncpa [#allocation6], 0 }
   0x2   :  { %10 = vsyncpa [#allocation4], 0  ;;  %s15_s14 = sshll.u32 %s244_s0, 4  ;;  %s201_s15 = smov [#allocation2]   ;;  %s16_s14 = int_to_ptr.hbm [resolvable:$true] %s15_s14 }
   0x3   :  { %s17_s16 = sshll.u32 %s201_s15, 4  ;;  %s29_s19 = sshll.u32 %s245_s1, 4  ;;  %s18_s16 = int_to_ptr.vmem [resolvable:$true] %s17_s16  ;;  %s30_s19 = int_to_ptr.hbm [resolvable:$true] %s29_s19 }
   0x4   :  { %s202_s20 = smov 128   ;;  %s203_s21 = smov 8  }
   0x5   :  { %23 = dma.hbm_to_vmem [thread:$0]  %s16_s14, 256, %s18_s16, [#allocation3], %s202_s20, %s202_s20, %s203_s21  }
   0x6   :  { %s204_s22 = smov [#allocation5]  }
   0x7   :  { %s31_s23 = sshll.u32 %s204_s22, 4  ;;  %s32_s23 = int_to_ptr.vmem [resolvable:$true] %s31_s23 }
   0x8   :  { %34 = dma.hbm_to_vmem [thread:$0]  %s30_s19, 16, %s32_s23, [#allocation6]  }
   0x9   :  { %195 = dma.done.wait [#allocation3], 256  }
   0xa   :  { %196 = vsyncadd [#allocation3], 4294967040 }
   0xb   :  { %197 = dma.done.wait [#allocation6], 16  }
   0xc   :  { %198 = vsyncadd [#allocation6], 4294967280  ;;  %v45_v0 = vld [vmem:[#allocation2] sm:$0xff]  ;;  %v46_v1 = vld [vmem:[#allocation2 + $0x8] sm:$0xff]  ;;  %s205_s24 = smov [#allocation7]   ;;  %s102_s28 = sshll.u32 %s247_s3, 4  ;;  %s103_s28 = int_to_ptr.hbm [resolvable:$true] %s102_s28 }
   0xd   :  { %v47_v2 = vadd.f32 %v46_v1, %v45_v0  ;;  %v55_v3 = vmul.f32 %v45_v0, %v45_v0  ;;  %v56_v4 = vmul.f32 %v46_v1, %v46_v1  ;;  %v79_v30 = vld [vmem:[#allocation5] sm:$0x1]  ;;  %v81_v33 = vld [vmem:[%s246_s2] sm:$0x1]  ;;  %s100_s25 = sshll.u32 %s205_s24, 4  ;;  %s101_s25 = int_to_ptr.vmem [resolvable:$true] %s100_s25 }
   0xf   :  { %v48_v5 = vrot.slane %v47_v2, 4  ;;  %v57_v6 = vadd.f32 %v56_v4, %v55_v3 }
  0x11   :  { %v49_v7 = vadd.f32 %v48_v5, %v47_v2  ;;  %v58_v8 = vrot.slane %v57_v6, 4 }
  0x13   :  { %v50_v9 = vrot.slane %v49_v7, 2  ;;  %v59_v10 = vadd.f32 %v58_v8, %v57_v6 }
  0x15   :  { %v51_v11 = vadd.f32 %v50_v9, %v49_v7  ;;  %v60_v12 = vrot.slane %v59_v10, 2 }
  0x17   :  { %v52_v13 = vrot.slane %v51_v11, 1  ;;  %v61_v14 = vadd.f32 %v60_v12, %v59_v10 }
  0x19   :  { %v53_v15 = vadd.f32 %v52_v13, %v51_v11  ;;  %v62_v16 = vrot.slane %v61_v14, 1 }
  0x1b   :  { %v54_v17 = vmul.f32 0.0625, %v53_v15  ;;  %v63_v18 = vadd.f32 %v62_v16, %v61_v14 }
  0x1d   :  { %v64_v19 = vmul.f32 0.0625, %v63_v18  ;;  %v65_v20 = vmul.f32 %v54_v17, %v54_v17 }
  0x1f   :  { %v66_v21 = vsub.f32 %v64_v19, %v65_v20 }
  0x21   :  { %v67_v22 = vmax.f32 %v66_v21, 0.0 }
  0x23   :  { %v68_v23 = vadd.f32 1e-05, %v67_v22 }
  0x25   :  { %121 = vrsqrt.f32 %v68_v23  ;;  %vm75_vm0 = vweird.f32 %v68_v23 }
  0x2b   :  { %v122_v24 = vpop.eup %121 }
  0x2c   :  { %v70_v25 = vmul.f32 %v122_v24, %v68_v23  ;;  %vm76_vm1 = vweird.f32 %v122_v24 }
  0x2d   :  { %vm77_vm2 = vmor %vm75_vm0, %vm76_vm1 }
  0x2e   :  { %v71_v26 = vmul.f32 %v122_v24, %v70_v25 }
  0x30   :  { %v72_v27 = vmul.f32 0.5, %v71_v26 }
  0x32   :  { %v73_v28 = vsub.f32 1.5, %v72_v27 }
  0x34   :  { %v74_v29 = vmul.f32 %v122_v24, %v73_v28 }
  0x36   :  { %v78_v31 = vsel %vm77_vm2, %v122_v24, %v74_v29 }
  0x37   :  { %v80_v32 = vmul.f32 %v79_v30, %v78_v31 }
  0x39   :  { %v82_v34 = vmul.f32 %v80_v32, %v54_v17  ;;  %v85_v35 = vperm.slane %v80_v32, 0 }
  0x3b   :  { %v83_v36 = vsub.f32 %v81_v33, %v82_v34  ;;  %v87_v37 = vmul.f32 %v85_v35, %v45_v0  ;;  %v88_v38 = vmul.f32 %v85_v35, %v46_v1 }
  0x3d   :  { %v90_v39 = vperm.slane %v83_v36, 0 }
  0x3f   :  { %v92_v40 = vadd.f32 %v90_v39, %v87_v37  ;;  %v93_v41 = vadd.f32 %v90_v39, %v88_v38 }
  0x41   :  { %94 = vst [vmem:[#allocation7] sm:$0xff] %v92_v40 }
  0x42   :  { %95 = vst [vmem:[#allocation7 + $0x8] sm:$0xff] %v93_v41 }
  0x43   :  { %108 = dma.vmem_to_hbm [thread:$0]  %s101_s25, 256, %s103_s28, [#allocation4], %s202_s20, %s202_s20, %s203_s21  }
  0x44   :  { %199 = dma.done.wait [#allocation4], 256  }
  0x45   :  { %200 = vsyncadd [#allocation4], 4294967040 }
  0x46   :  { %113 = vsyncpa [#allocation3], 1 }
  0x47   :  { %114 = vsyncpa [#allocation6], 1 }
  0x48   :  { %115 = vsyncpa [#allocation4], 1 }

</bundles_post_ra>
